<compile_context>
chip_gen: v6e
topology: v6e:2x2x1
jax: 0.10.0
libtpu: 0.0.40
codegen_flags: <defaults>
</compile_context>

<pallas_src>
import math

import jax
import jax.numpy as jnp
from jax.experimental import pallas as pl
from jax.experimental.pallas import tpu as pltpu


def _dyt_kernel(x_ref, w_ref, b_ref, o_ref):
    # Elementwise hot path: tanh (EUP) + mul/add (VPU) on the VMEM tile.
    # Compute in f32 regardless of storage dtype (free: VPU/EUP have slack).
    x = x_ref[...].astype(jnp.float32)
    w = w_ref[...]          # (1, bf) f32 -> broadcasts over rows
    b = b_ref[...]          # (1, bf) f32
    y = jnp.tanh(x) * w + b
    o_ref[...] = y.astype(o_ref.dtype)


def dynamic_tanh(x, weight, bias, *,
                 target_tile_bytes=8 * 1024 * 1024,
                 feature_block=2048):
    """Apply DynamicTanh along the last axis of x.

    x:       (..., F)   any float dtype (kept in that dtype through HBM/VMEM)
    weight:  (F,)
    bias:    (F,)
    """
    orig_shape = x.shape
    F = orig_shape[-1]
    rows = math.prod(orig_shape[:-1]) if len(orig_shape) > 1 else 1

    w_f32 = weight.astype(jnp.float32)
    b_f32 = bias.astype(jnp.float32)

    # ---- Layout: present a lane-dense slab to the kernel ------------------
    # Small-F path: fold features into full 128-wide lanes so the output last
    # dim is a multiple of 128 (avoids masked vst partial stores).
    if F < 128 and 128 % F == 0 and (rows * F) % 128 == 0:
        reps = 128 // F
        x2d = x.reshape(rows * F // 128, 128)
        w2d = jnp.tile(w_f32, (reps,)).reshape(1, 128)
        b2d = jnp.tile(b_f32, (reps,)).reshape(1, 128)
    else:
        x2d = x.reshape(rows, F)
        w2d = w_f32.reshape(1, F)
        b2d = b_f32.reshape(1, F)

    R, C = x2d.shape
    itemsize = x2d.dtype.itemsize

    # ---- Feature-axis tiling ----------------------------------------------
    if C > feature_block:
        bf = feature_block          # multiple of 128
    else:
        bf = C                      # full feature extent (always legal)

    # ---- Row-axis tiling: size the tile against VMEM ----------------------
    # Sublane granularity: 8 for 32-bit, 16 for 16-bit, 32 for 8-bit dtypes.
    sub = max(8, 32 // max(itemsize, 1))
    if R <= sub:
        br = R                      # block equals full dim -> legal
    else:
        br = max(1, target_tile_bytes // (bf * itemsize))
        br = max(sub, (br // sub) * sub)
        br = min(br, (R // sub) * sub)   # keep full-size tiles; last one ragged

    grid = (pl.cdiv(R, br), pl.cdiv(C, bf))

    # ---- VMEM budget: double-buffered x-in and out tiles + weight/bias ----
    tile_bytes = br * bf * itemsize
    vmem_limit = int(4 * tile_bytes + 4 * bf * 4 + (4 << 20))
    vmem_limit = max(vmem_limit, 32 << 20)
    vmem_limit = min(vmem_limit, 56 << 20)   # headroom under v7x 64 MiB VMEM

    cost = pl.CostEstimate(
        flops=2 * R * C,
        transcendentals=R * C,
        bytes_accessed=2 * R * C * itemsize + 2 * C * 4,
    )

    out2d = pl.pallas_call(
        _dyt_kernel,
        out_shape=jax.ShapeDtypeStruct((R, C), x.dtype),
        grid_spec=pltpu.PrefetchScalarGridSpec(
            num_scalar_prefetch=0,
            grid=grid,
            in_specs=[
                pl.BlockSpec((br, bf), lambda i, j: (i, j)),   # x tile
                pl.BlockSpec((1, bf), lambda i, j: (0, j)),    # weight
                pl.BlockSpec((1, bf), lambda i, j: (0, j)),    # bias
            ],
            out_specs=pl.BlockSpec((br, bf), lambda i, j: (i, j)),
        ),
        compiler_params=pltpu.CompilerParams(
            dimension_semantics=("parallel", "parallel"),
            vmem_limit_bytes=vmem_limit,
        ),
        cost_estimate=cost,
    )(x2d, w2d, b2d)

    return out2d.reshape(orig_shape)


if __name__ == "__main__":
    key = jax.random.PRNGKey(0)
    batch, seq, hidden = 2, 8, 32

    # Deterministic parameter init, matching the module's __init__:
    #   weight = ones(num_features) * 0.1, bias = zeros(num_features)
    num_features = hidden
    weight = jnp.ones((num_features,), dtype=jnp.float32) * 0.1
    bias = jnp.zeros((num_features,), dtype=jnp.float32)

    x = jax.random.normal(key, (batch, seq, hidden), dtype=jnp.float32)

    y = dynamic_tanh(x, weight, bias)
    y = jax.block_until_ready(y)

    # Reference check in plain JAX (small-F lane-folded path).
    y_ref = jnp.tanh(x) * weight + bias
    assert y.shape == x.shape
    assert jnp.allclose(y, y_ref, atol=1e-6, rtol=1e-6)

    # Also exercise the general (non-folded, F >= 128) path with a small shape.
    F2 = 256
    w2 = jnp.ones((F2,), dtype=jnp.float32) * 0.1
    b2 = jnp.zeros((F2,), dtype=jnp.float32)
    x2 = jax.random.normal(jax.random.PRNGKey(1), (3, 5, F2), dtype=jnp.float32)
    y2 = jax.block_until_ready(dynamic_tanh(x2, w2, b2))
    assert jnp.allclose(y2, jnp.tanh(x2) * w2 + b2, atol=1e-6, rtol=1e-6)

    print("KERNEL_OK")
</pallas_src>

<mosaic_0001>
module attributes {stable_mosaic.version = 11 : i64} {
  func.func @_dyt_kernel(%arg0: i32, %arg1: i32, %arg2: memref<4x128xf32, #tpu.memory_space<vmem>>, %arg3: memref<1x128xf32, #tpu.memory_space<vmem>>, %arg4: memref<1x128xf32, #tpu.memory_space<vmem>>, %arg5: memref<4x128xf32, #tpu.memory_space<vmem>>) attributes {dimension_semantics = [#tpu.dimension_semantics<parallel>, #tpu.dimension_semantics<parallel>], iteration_bounds = array<i64: 1, 1>, scalar_prefetch = 0 : i64, scratch_operands = 0 : i64, tpu.core_type = #tpu.core_type<tc>, window_params = [{transform_indices = @transform_0, window_bounds = array<i64: 4, 128>}, {transform_indices = @transform_1, window_bounds = array<i64: 1, 128>}, {transform_indices = @transform_2, window_bounds = array<i64: 1, 128>}, {transform_indices = @transform_3, window_bounds = array<i64: 4, 128>}]} {
    %c0 = arith.constant 0 : index
    %c0_0 = arith.constant 0 : index
    %0 = vector.load %arg2[%c0, %c0_0] : memref<4x128xf32, #tpu.memory_space<vmem>>, vector<4x128xf32>
    %c0_1 = arith.constant 0 : index
    %c0_2 = arith.constant 0 : index
    %1 = vector.load %arg3[%c0_1, %c0_2] : memref<1x128xf32, #tpu.memory_space<vmem>>, vector<1x128xf32>
    %c0_3 = arith.constant 0 : index
    %c0_4 = arith.constant 0 : index
    %2 = vector.load %arg4[%c0_3, %c0_4] : memref<1x128xf32, #tpu.memory_space<vmem>>, vector<1x128xf32>
    %3 = math.tanh %0 : vector<4x128xf32>
    %4 = vector.broadcast %1 : vector<1x128xf32> to vector<4x128xf32>
    %5 = arith.mulf %3, %4 : vector<4x128xf32>
    %6 = vector.broadcast %2 : vector<1x128xf32> to vector<4x128xf32>
    %7 = arith.addf %5, %6 : vector<4x128xf32>
    %c0_5 = arith.constant 0 : index
    %c0_6 = arith.constant 0 : index
    %8 = vector.load %arg5[%c0_5, %c0_6] : memref<4x128xf32, #tpu.memory_space<vmem>>, vector<4x128xf32>
    tpu.vector_store %arg5[%c0_5, %c0_6], %7 {strides = array<i32>} : memref<4x128xf32, #tpu.memory_space<vmem>>, vector<4x128xf32>,
    return
  }
  func.func @transform_0(%arg0: i32, %arg1: i32) -> (i32, i32) {
    %c0_i32 = arith.constant 0 : i32
    return %arg0, %arg1 : i32, i32
  }
  func.func @transform_1(%arg0: i32, %arg1: i32) -> (i32, i32) {
    %c0_i32 = arith.constant 0 : i32
    %c0_i32_0 = arith.constant 0 : i32
    return %c0_i32, %arg1 : i32, i32
  }
  func.func @transform_2(%arg0: i32, %arg1: i32) -> (i32, i32) {
    %c0_i32 = arith.constant 0 : i32
    %c0_i32_0 = arith.constant 0 : i32
    return %c0_i32, %arg1 : i32, i32
  }
  func.func @transform_3(%arg0: i32, %arg1: i32) -> (i32, i32) {
    %c0_i32 = arith.constant 0 : i32
    return %arg0, %arg1 : i32, i32
  }
}

</mosaic_0001>

<bundles_post_ra>
// kernel: tpu_custom_call.1
= control target key start
LH: loop header
LB: loop body
LE: loop exit
PB: predicated region body
PF: predicated region fallthrough
CT: control target
= control target key end

     0   :  { %8 = vsyncpa [#allocation3], 0  ;;  %s145_s0 = inlined_call_operand.hbm [shape: f32[4,128], index: 0, kind: input, shape index: {}]   ;;  %s146_s1 = inlined_call_operand.vmem [shape: f32[1,128], index: 1, kind: input, shape index: {}]   ;;  %s147_s2 = inlined_call_operand.vmem [shape: f32[1,128], index: 2, kind: input, shape index: {}]   ;;  %s148_s3 = inlined_call_operand.hbm [shape: f32[4,128], index: 3, kind: output, shape index: {}]  }
   0x1   :  { %9 = vsyncpa [#allocation4], 0  ;;  %s111_s12 = smov [#allocation2]  }
   0x2   :  { %s16_s13 = sshll.u32 %s111_s12, 4  ;;  %s17_s13 = int_to_ptr.vmem [resolvable:$true] %s16_s13 }
   0x3   :  { %s75_s14 = scalar_lea.vmem %s17_s13, 64  ;;  %p80_p1 = scmp.lt.s32.totalorder %s17_s13, %s17_s13 }
   0x4   :  { %p76_p0 = scmp.ne.s32.totalorder %s17_s13, %s75_s14  ;;  %p81_p2 = scmp.lt.s32.totalorder %s75_s14, %s75_s14 }
   0x6   :  { %p82_p3 = por %p81_p2, %p80_p1 }
   0x8   :  { %p83_p4 = pnand %p82_p3, %p76_p0 }
   0xa   :  { %86 = shalt.err (!%p83_p4)
}
   0xb   :  { %19 = dma.hbm_to_vmem [thread:$0]  %s145_s0, 64, %s17_s13, [#allocation3]  }
   0xc   :  { %107 = dma.done.wait [#allocation3], 64  }
   0xd   :  { %108 = vsyncadd [#allocation3], 4294967232  ;;  %v27_v0 = vld [vmem:[#allocation2] sm:$0xf]  ;;  %s112_s21 = smov [#allocation5]  }
   0xe   :  { %65 = vtanh.f32 %v27_v0  ;;  %v61_v1 = vld [vmem:[%s146_s1] ss:$0 sm:$0xff]  ;;  %s52_s22 = sshll.u32 %s112_s21, 4  ;;  %s53_s22 = int_to_ptr.vmem [resolvable:$true] %s52_s22 }
   0xf   :  { %v62_v3 = vld [vmem:[%s147_s2] ss:$0 sm:$0xff]  ;;  %s87_s0 = scalar_lea.vmem %s53_s22, 64  ;;  %p92_p6 = scmp.lt.s32.totalorder %s53_s22, %s53_s22 }
  0x10   :  { %p88_p5 = scmp.ne.s32.totalorder %s53_s22, %s87_s0  ;;  %p93_p7 = scmp.lt.s32.totalorder %s87_s0, %s87_s0 }
  0x12   :  { %p94_p8 = por %p93_p7, %p92_p6 }
  0x14   :  { %p95_p9 = pnand %p94_p8, %p88_p5 }
  0x1b   :  { %v66_v2 = vpop.eup %65 }
  0x1c   :  { %v37_v4 = vmul.f32 %v66_v2, %v61_v1 }
  0x1e   :  { %v44_v5 = vadd.f32 %v62_v3, %v37_v4 }
  0x20   :  { %45 = vst [vmem:[#allocation5] sm:$0xf] %v44_v5 }
  0x21   :  { %98 = shalt.err (!%p95_p9)
}
  0x22   :  { %55 = dma.vmem_to_hbm [thread:$0]  %s53_s22, 64, %s148_s3, [#allocation4]  }
  0x23   :  { %109 = dma.done.wait [#allocation4], 64  }
  0x24   :  { %110 = vsyncadd [#allocation4], 4294967232 }
  0x25   :  { %59 = vsyncpa [#allocation3], 1 }
  0x26   :  { %60 = vsyncpa [#allocation4], 1 }

</bundles_post_ra>
